<compile_context>
chip_gen: v7x
topology: tpu7x:2x2x1
jax: 0.10.0
libtpu: 0.0.40
codegen_flags: <defaults>
</compile_context>

<pallas_src>
import functools

import jax
import jax.numpy as jnp
from jax.experimental import pallas as pl
from jax.experimental.pallas import tpu as pltpu


def _sure_kernel(x_ref, w_ref, bias_ref, o_ref, patch_ref, *, B, C, H, W, Wp,
                 noise_std):
    """Fused conv + SURE reductions for one small batch, entirely in VMEM.

    x_ref     : (2*B*C, lanes)   rows = [y images ; b images]; each row is one
                (batch, channel) image zero padded to (H+2, Wp), flattened, with
                one extra zero lane on the left so every conv tap is an
                in-bounds lane slice; lanes is a multiple of 128.
    w_ref     : (2*B*C, 9*2*B*C) block-diagonal im2col conv weight (no bias)
    bias_ref  : (B*C, 1)         conv bias per (batch, channel) row
    o_ref     : (1, 1)           scalar loss
    patch_ref : (9*2*B*C, H*Wp)  VMEM scratch holding the im2col patch matrix
    """
    P = H * Wp                 # output positions per row (incl. masked pad cols)
    R = B * C
    two_r = 2 * R

    x = x_ref[...]             # (2R, lanes)

    # im2col: the 9 conv taps are contiguous (lane-shifted) slices of the
    # zero-padded flat rows.  Write each directly into the lane-aligned patch
    # scratch: sublane offsets are multiples of 2R, lane extent is the full
    # P = H*Wp (multiple of 128), so every store is an unmasked full vreg.
    for t in range(9):
        ky, kx = divmod(t, 3)
        start = ky * Wp + kx
        patch_ref[t * two_r:(t + 1) * two_r, :] = x[:, start:start + P]

    # Single MXU contraction: (2R, 9*2R) x (9*2R, P) -> (2R, P), conv w/o bias.
    conv = jnp.dot(w_ref[...], patch_ref[...],
                   preferred_element_type=jnp.float32)

    # Center (unshifted, ky=kx=1) tap = padded y / b values at every position.
    center = patch_ref[4 * two_r:5 * two_r, :]
    y_vals = center[:R]                      # noisy y
    b_vals = center[R:]                      # MC probe b (zero on pad columns)
    f_y = conv[:R] + bias_ref[...]           # model(noisy) = conv(y) + bias
    conv_b = conv[R:]                        # conv_nobias(b)

    # Valid-pixel mask (drop zero-pad columns).  Wp is a power of two, so the
    # modulo lowers to a lane AND.
    col = jax.lax.broadcasted_iota(jnp.int32, (1, P), 1) % Wp
    valid = jnp.logical_and(col >= 1, col <= W)

    n_el = float(B * C * H * W)              # MSELoss 'mean' denominator
    n = float(C * H * W)                     # N in the SURE formula

    # MSELoss(noisy, model(noisy)), reduction='mean'.  Mask is required here:
    # f_y is nonzero (bias + wrapped taps) on the pad columns.
    mse = jnp.sum(jnp.where(valid, (y_vals - f_y) ** 2, 0.0),
                  keepdims=True) / n_el      # (1, 1)
    # Monte-Carlo divergence.  No mask needed: b_vals is exactly zero on the
    # pad columns (relies on the zero padding).  Linear model => eps cancels
    # exactly, so div = sum(b * conv_nobias(b)) / N.
    div = jnp.sum(b_vals * conv_b, keepdims=True) / n   # (1, 1)

    c = float(noise_std) ** 2
    o_ref[...] = jnp.abs(mse - c + 2.0 * c * div)


def make_sure_loss(w_hwio, bias, noise_std, *, batch, channels, height, width,
                   epsilon=None):
    """Precompute model-dependent constants once; return a jitted loss fn.

    `epsilon` is kept for API parity with the PyTorch module but is unused:
    the synthetic model is linear, so epsilon cancels exactly in the
    Monte-Carlo divergence (the reference below still uses it literally).
    NOTE: that cancellation (and the single-conv kernel) is only valid while
    the model stays strictly linear (conv + bias, no ReLU / normalization).
    """
    del epsilon
    B, C, H, W = batch, channels, height, width
    R = B * C
    Wp = pl.next_power_of_2(W + 2)                  # lane-friendly padded width
    P = H * Wp
    lanes = pl.cdiv((H + 2) * Wp + 2, 128) * 128    # 128-aligned input row width

    # ---- model-dependent constants: built ONCE, outside the hot path ----
    # Block-diagonal im2col weight: out rows = (src, batch, co),
    # contraction index = (tap, src, batch, ci);  value = w[ky,kx,ci,co].
    w9 = jnp.transpose(jnp.asarray(w_hwio, jnp.float32).reshape(9, C, C),
                       (0, 2, 1))                                    # (t, co, ci)
    eye = jnp.eye(2 * B, dtype=jnp.float32)
    w_big = jnp.concatenate([jnp.kron(eye, w9[t]) for t in range(9)],
                            axis=1)                                  # (2R, 18R)
    bias_rows = jnp.tile(jnp.asarray(bias, jnp.float32).reshape(1, C),
                         (B, 1)).reshape(R, 1)                       # (R, 1)

    kernel = functools.partial(_sure_kernel, B=B, C=C, H=H, W=W, Wp=Wp,
                               noise_std=float(noise_std))
    vmem = pl.BlockSpec(memory_space=pltpu.MemorySpace.VMEM)
    bytes_accessed = 4 * (2 * R * lanes + w_big.size + bias_rows.size + 1)
    call = pl.pallas_call(
        kernel,
        out_shape=jax.ShapeDtypeStruct((1, 1), jnp.float32),
        in_specs=[vmem, vmem, vmem],
        out_specs=vmem,
        scratch_shapes=[pltpu.VMEM((9 * 2 * R, P), jnp.float32)],
        cost_estimate=pl.CostEstimate(
            flops=2 * (2 * R) * (9 * 2 * R) * P,
            transcendentals=0,
            bytes_accessed=bytes_accessed),
    )

    @jax.jit
    def loss_fn(noisy_nchw, b_nchw):
        # Consolidated data prep, no NCHW->NHWC transpose anywhere:
        # concat y and the probe on the leading axis (rows stay (batch, chan)
        # major), then one spatial zero-pad + flatten + one lane pad.
        x = jnp.concatenate([noisy_nchw, b_nchw], axis=0).astype(jnp.float32)
        x = x.reshape(2 * R, H, W)
        x = jnp.pad(x, ((0, 0), (1, 1), (1, Wp - W - 1)))   # (2R, H+2, Wp)
        x = x.reshape(2 * R, (H + 2) * Wp)
        x_rows = jnp.pad(x, ((0, 0), (1, lanes - 1 - (H + 2) * Wp)))  # (2R, lanes)
        return call(x_rows, w_big, bias_rows)[0, 0]

    return loss_fn


# ---------------- pure-JAX reference (for correctness check) ----------------

def _model_ref(x_nhwc, w_hwio, bias):
    out = jax.lax.conv_general_dilated(
        x_nhwc, w_hwio, window_strides=(1, 1), padding="SAME",
        dimension_numbers=("NHWC", "HWIO", "NHWC"))
    return out + bias.reshape(1, 1, 1, -1)


def sure_loss_ref(noisy_nchw, b_nchw, w_hwio, bias, noise_std, epsilon=None):
    y = jnp.transpose(noisy_nchw, (0, 2, 3, 1)).astype(jnp.float32)
    bb = jnp.transpose(b_nchw, (0, 2, 3, 1)).astype(jnp.float32)
    B, H, W, C = y.shape
    N = C * H * W
    eps = jnp.max(y) / 1000.0 if epsilon is None else jnp.float32(epsilon)
    f_y = _model_ref(y, w_hwio, bias)
    f_yb = _model_ref(y + eps * bb, w_hwio, bias)
    mse = jnp.mean((y - f_y) ** 2)
    div = jnp.sum(bb * (f_yb - f_y)) / (N * eps)
    c = float(noise_std) ** 2
    return jnp.abs(mse - c + 2.0 * c * div)


if __name__ == "__main__":
    B, C, H, W = 2, 4, 16, 16
    noise_std = 0.1

    key = jax.random.PRNGKey(0)
    k_noisy, k_b, k_w, k_bias = jax.random.split(key, 4)

    # PyTorch-style NCHW input, plus the gaussian probe b that the torch module
    # samples inside forward (drawn here deterministically).
    noisy = jax.random.normal(k_noisy, (B, C, H, W), dtype=jnp.float32)
    b_probe = jax.random.normal(k_b, (B, C, H, W), dtype=jnp.float32)

    # Deterministic "model" parameters: Conv2d(C, C, 3, padding=1), HWIO layout.
    w_hwio = 0.1 * jax.random.normal(k_w, (3, 3, C, C), dtype=jnp.float32)
    bias = 0.05 * jax.random.normal(k_bias, (C,), dtype=jnp.float32)

    sure_loss = make_sure_loss(w_hwio, bias, noise_std,
                               batch=B, channels=C, height=H, width=W,
                               epsilon=None)

    loss = jax.block_until_ready(sure_loss(noisy, b_probe))
    loss_ref = jax.block_until_ready(
        sure_loss_ref(noisy, b_probe, w_hwio, bias, noise_std, epsilon=None))

    assert jnp.allclose(loss, loss_ref, rtol=1e-4, atol=1e-5), (loss, loss_ref)
    print("KERNEL_OK")
</pallas_src>

<mosaic_0001>
module attributes {stable_mosaic.version = 11 : i64} {
  func.func @_sure_kernel(%arg0: memref<16x640xf32, #tpu.memory_space<vmem>>, %arg1: memref<16x144xf32, #tpu.memory_space<vmem>>, %arg2: memref<8x1xf32, #tpu.memory_space<vmem>>, %arg3: memref<1x1xf32, #tpu.memory_space<vmem>>, %arg4: memref<144x512xf32, #tpu.memory_space<vmem>>) attributes {dimension_semantics = [], scalar_prefetch = 0 : i64, scratch_operands = 1 : i64, tpu.core_type = #tpu.core_type<tc>} {
    %c0 = arith.constant 0 : index
    %c0_0 = arith.constant 0 : index
    %0 = vector.load %arg0[%c0, %c0_0] : memref<16x640xf32, #tpu.memory_space<vmem>>, vector<16x640xf32>
    %1 = vector.extract_strided_slice %0 {offsets = [0, 0], sizes = [16, 512], strides = [1, 1]} : vector<16x640xf32> to vector<16x512xf32>
    %c0_1 = arith.constant 0 : index
    %c0_2 = arith.constant 0 : index
    %2 = vector.load %arg4[%c0_1, %c0_2] : memref<144x512xf32, #tpu.memory_space<vmem>>, vector<16x512xf32>
    tpu.vector_store %arg4[%c0_1, %c0_2], %1 {strides = array<i32>} : memref<144x512xf32, #tpu.memory_space<vmem>>, vector<16x512xf32>,
    %3 = vector.extract_strided_slice %0 {offsets = [0, 1], sizes = [16, 512], strides = [1, 1]} : vector<16x640xf32> to vector<16x512xf32>
    %c16 = arith.constant 16 : index
    %c0_3 = arith.constant 0 : index
    %4 = vector.load %arg4[%c16, %c0_3] : memref<144x512xf32, #tpu.memory_space<vmem>>, vector<16x512xf32>
    tpu.vector_store %arg4[%c16, %c0_3], %3 {strides = array<i32>} : memref<144x512xf32, #tpu.memory_space<vmem>>, vector<16x512xf32>,
    %5 = vector.extract_strided_slice %0 {offsets = [0, 2], sizes = [16, 512], strides = [1, 1]} : vector<16x640xf32> to vector<16x512xf32>
    %c32 = arith.constant 32 : index
    %c0_4 = arith.constant 0 : index
    %6 = vector.load %arg4[%c32, %c0_4] : memref<144x512xf32, #tpu.memory_space<vmem>>, vector<16x512xf32>
    tpu.vector_store %arg4[%c32, %c0_4], %5 {strides = array<i32>} : memref<144x512xf32, #tpu.memory_space<vmem>>, vector<16x512xf32>,
    %7 = vector.extract_strided_slice %0 {offsets = [0, 32], sizes = [16, 512], strides = [1, 1]} : vector<16x640xf32> to vector<16x512xf32>
    %c48 = arith.constant 48 : index
    %c0_5 = arith.constant 0 : index
    %8 = vector.load %arg4[%c48, %c0_5] : memref<144x512xf32, #tpu.memory_space<vmem>>, vector<16x512xf32>
    tpu.vector_store %arg4[%c48, %c0_5], %7 {strides = array<i32>} : memref<144x512xf32, #tpu.memory_space<vmem>>, vector<16x512xf32>,
    %9 = vector.extract_strided_slice %0 {offsets = [0, 33], sizes = [16, 512], strides = [1, 1]} : vector<16x640xf32> to vector<16x512xf32>
    %c64 = arith.constant 64 : index
    %c0_6 = arith.constant 0 : index
    %10 = vector.load %arg4[%c64, %c0_6] : memref<144x512xf32, #tpu.memory_space<vmem>>, vector<16x512xf32>
    tpu.vector_store %arg4[%c64, %c0_6], %9 {strides = array<i32>} : memref<144x512xf32, #tpu.memory_space<vmem>>, vector<16x512xf32>,
    %11 = vector.extract_strided_slice %0 {offsets = [0, 34], sizes = [16, 512], strides = [1, 1]} : vector<16x640xf32> to vector<16x512xf32>
    %c80 = arith.constant 80 : index
    %c0_7 = arith.constant 0 : index
    %12 = vector.load %arg4[%c80, %c0_7] : memref<144x512xf32, #tpu.memory_space<vmem>>, vector<16x512xf32>
    tpu.vector_store %arg4[%c80, %c0_7], %11 {strides = array<i32>} : memref<144x512xf32, #tpu.memory_space<vmem>>, vector<16x512xf32>,
    %13 = vector.extract_strided_slice %0 {offsets = [0, 64], sizes = [16, 512], strides = [1, 1]} : vector<16x640xf32> to vector<16x512xf32>
    %c96 = arith.constant 96 : index
    %c0_8 = arith.constant 0 : index
    %14 = vector.load %arg4[%c96, %c0_8] : memref<144x512xf32, #tpu.memory_space<vmem>>, vector<16x512xf32>
    tpu.vector_store %arg4[%c96, %c0_8], %13 {strides = array<i32>} : memref<144x512xf32, #tpu.memory_space<vmem>>, vector<16x512xf32>,
    %15 = vector.extract_strided_slice %0 {offsets = [0, 65], sizes = [16, 512], strides = [1, 1]} : vector<16x640xf32> to vector<16x512xf32>
    %c112 = arith.constant 112 : index
    %c0_9 = arith.constant 0 : index
    %16 = vector.load %arg4[%c112, %c0_9] : memref<144x512xf32, #tpu.memory_space<vmem>>, vector<16x512xf32>
    tpu.vector_store %arg4[%c112, %c0_9], %15 {strides = array<i32>} : memref<144x512xf32, #tpu.memory_space<vmem>>, vector<16x512xf32>,
    %17 = vector.extract_strided_slice %0 {offsets = [0, 66], sizes = [16, 512], strides = [1, 1]} : vector<16x640xf32> to vector<16x512xf32>
    %c128 = arith.constant 128 : index
    %c0_10 = arith.constant 0 : index
    %18 = vector.load %arg4[%c128, %c0_10] : memref<144x512xf32, #tpu.memory_space<vmem>>, vector<16x512xf32>
    tpu.vector_store %arg4[%c128, %c0_10], %17 {strides = array<i32>} : memref<144x512xf32, #tpu.memory_space<vmem>>, vector<16x512xf32>,
    %c0_11 = arith.constant 0 : index
    %c0_12 = arith.constant 0 : index
    %19 = vector.load %arg1[%c0_11, %c0_12] : memref<16x144xf32, #tpu.memory_space<vmem>>, vector<16x144xf32>
    %c0_13 = arith.constant 0 : index
    %c0_14 = arith.constant 0 : index
    %20 = vector.load %arg4[%c0_13, %c0_14] : memref<144x512xf32, #tpu.memory_space<vmem>>, vector<144x512xf32>
    %cst = arith.constant dense<0.000000e+00> : vector<16x512xf32>
    %21 = tpu.matmul %19, %20, %cst {dimension_numbers = #tpu.dot_dimension_numbers<[1], [0], [0], [1], [0, 0, 1, 1], [], []>} : vector<16x144xf32>, vector<144x512xf32>, vector<16x512xf32> -> vector<16x512xf32>
    %c64_15 = arith.constant 64 : index
    %c0_16 = arith.constant 0 : index
    %22 = vector.load %arg4[%c64_15, %c0_16] : memref<144x512xf32, #tpu.memory_space<vmem>>, vector<16x512xf32>
    %23 = vector.extract_strided_slice %22 {offsets = [0, 0], sizes = [8, 512], strides = [1, 1]} : vector<16x512xf32> to vector<8x512xf32>
    %24 = vector.extract_strided_slice %22 {offsets = [8, 0], sizes = [8, 512], strides = [1, 1]} : vector<16x512xf32> to vector<8x512xf32>
    %25 = vector.extract_strided_slice %21 {offsets = [0, 0], sizes = [8, 512], strides = [1, 1]} : vector<16x512xf32> to vector<8x512xf32>
    %c0_17 = arith.constant 0 : index
    %c0_18 = arith.constant 0 : index
    %26 = vector.load %arg2[%c0_17, %c0_18] : memref<8x1xf32, #tpu.memory_space<vmem>>, vector<8x1xf32>
    %27 = vector.broadcast %26 : vector<8x1xf32> to vector<8x512xf32>
    %28 = arith.addf %25, %27 : vector<8x512xf32>
    %29 = vector.extract_strided_slice %21 {offsets = [8, 0], sizes = [8, 512], strides = [1, 1]} : vector<16x512xf32> to vector<8x512xf32>
    %30 = tpu.iota {dimensions = array<i32: 1>} : vector<1x512xi32>
    %c32_i32 = arith.constant 32 : i32
    %c0_i32 = arith.constant 0 : i32
    %31 = arith.cmpi eq, %c32_i32, %c0_i32 : i32
    %c1_i32 = arith.constant 1 : i32
    %32 = arith.select %31, %c1_i32, %c32_i32 : i32
    %33 = vector.broadcast %32 : i32 to vector<1x512xi32>
    %34 = arith.remsi %30, %33 : vector<1x512xi32>
    %c0_i32_19 = arith.constant 0 : i32
    %35 = vector.broadcast %c0_i32_19 : i32 to vector<1x512xi32>
    %36 = arith.cmpi ne, %34, %35 : vector<1x512xi32>
    %c0_i32_20 = arith.constant 0 : i32
    %37 = vector.broadcast %c0_i32_20 : i32 to vector<1x512xi32>
    %38 = arith.cmpi slt, %34, %37 : vector<1x512xi32>
    %c0_i32_21 = arith.constant 0 : i32
    %39 = arith.cmpi slt, %32, %c0_i32_21 : i32
    %40 = vector.broadcast %39 : i1 to vector<1x512xi1>
    %41 = vector.broadcast %40 : vector<1x512xi1> to vector<1x512xi1>
    %42 = arith.xori %38, %41 : vector<1x512xi1>
    %43 = arith.andi %42, %36 : vector<1x512xi1>
    %44 = vector.broadcast %32 : i32 to vector<1x512xi32>
    %45 = arith.addi %34, %44 : vector<1x512xi32>
    %46 = arith.select %43, %45, %34 : vector<1x512xi1>, vector<1x512xi32>
    %c1_i32_22 = arith.constant 1 : i32
    %47 = vector.broadcast %c1_i32_22 : i32 to vector<1x512xi32>
    %48 = arith.cmpi sge, %46, %47 : vector<1x512xi32>
    %c16_i32 = arith.constant 16 : i32
    %49 = vector.broadcast %c16_i32 : i32 to vector<1x512xi32>
    %50 = arith.cmpi sle, %46, %49 : vector<1x512xi32>
    %51 = arith.andi %48, %50 : vector<1x512xi1>
    %52 = arith.subf %23, %28 : vector<8x512xf32>
    %53 = arith.mulf %52, %52 : vector<8x512xf32>
    %cst_23 = arith.constant 0.000000e+00 : f32
    %54 = vector.shape_cast %51 : vector<1x512xi1> to vector<1x512xi1>
    %55 = vector.broadcast %54 : vector<1x512xi1> to vector<8x512xi1>
    %56 = vector.broadcast %cst_23 : f32 to vector<8x512xf32>
    %57 = arith.select %55, %53, %56 : vector<8x512xi1>, vector<8x512xf32>
    %58 = vector.shape_cast %57 : vector<8x512xf32> to vector<1x8x512xf32>
    %cst_24 = arith.constant dense<0.000000e+00> : vector<1xf32>
    %59 = vector.multi_reduction <add>, %58, %cst_24 [1, 2] : vector<1x8x512xf32> to vector<1xf32>
    %60 = vector.shape_cast %59 : vector<1xf32> to vector<1x1x1xf32>
    %61 = vector.extract %60[0, 0, 0] : f32 from vector<1x1x1xf32>
    %62 = vector.broadcast %61 : f32 to vector<1x1xf32>
    %cst_25 = arith.constant 2.048000e+03 : f32
    %63 = vector.broadcast %cst_25 : f32 to vector<1x1xf32>
    %64 = arith.divf %62, %63 : vector<1x1xf32>
    %65 = arith.mulf %24, %29 : vector<8x512xf32>
    %66 = vector.shape_cast %65 : vector<8x512xf32> to vector<1x8x512xf32>
    %cst_26 = arith.constant dense<0.000000e+00> : vector<1xf32>
    %67 = vector.multi_reduction <add>, %66, %cst_26 [1, 2] : vector<1x8x512xf32> to vector<1xf32>
    %68 = vector.shape_cast %67 : vector<1xf32> to vector<1x1x1xf32>
    %69 = vector.extract %68[0, 0, 0] : f32 from vector<1x1x1xf32>
    %70 = vector.broadcast %69 : f32 to vector<1x1xf32>
    %cst_27 = arith.constant 1.024000e+03 : f32
    %71 = vector.broadcast %cst_27 : f32 to vector<1x1xf32>
    %72 = arith.divf %70, %71 : vector<1x1xf32>
    %cst_28 = arith.constant 0.00999999977 : f32
    %73 = vector.broadcast %cst_28 : f32 to vector<1x1xf32>
    %74 = arith.subf %64, %73 : vector<1x1xf32>
    %cst_29 = arith.constant 2.000000e-02 : f32
    %75 = vector.broadcast %cst_29 : f32 to vector<1x1xf32>
    %76 = arith.mulf %75, %72 : vector<1x1xf32>
    %77 = arith.addf %74, %76 : vector<1x1xf32>
    %78 = math.absf %77 : vector<1x1xf32>
    %c0_30 = arith.constant 0 : index
    %c0_31 = arith.constant 0 : index
    %79 = vector.load %arg3[%c0_30, %c0_31] : memref<1x1xf32, #tpu.memory_space<vmem>>, vector<1x1xf32>
    tpu.vector_store %arg3[%c0_30, %c0_31], %78 {strides = array<i32>} : memref<1x1xf32, #tpu.memory_space<vmem>>, vector<1x1xf32>,
    return
  }
}

</mosaic_0001>

<bundles_post_ra>
// kernel: loss_fn.1
= control target key start
LH: loop header
LB: loop body
LE: loop exit
PB: predicated region body
PF: predicated region fallthrough
CT: control target
= control target key end

     0   :  { %s1089_s28 = smov 127   ;;  %s1360_s0 = inlined_call_operand.vmem [shape: f32[16,640], index: 0, kind: input, shape index: {}]   ;;  %s1361_s1 = inlined_call_operand.vmem [shape: f32[16,144], index: 1, kind: input, shape index: {}]   ;;  %s1362_s2 = inlined_call_operand.vmem [shape: f32[8,1], index: 2, kind: input, shape index: {}]   ;;  %s1363_s3 = inlined_call_operand.hbm [shape: f32[1,1], index: 3, kind: output, shape index: {}]  }
   0x1   :  { %v16_v0 = vld [vmem:[%s1360_s0 + $0x8] sm:$0xff]  ;;  %v17_v1 = vld [vmem:[%s1360_s0 + $0x10] sm:$0xff]  ;;  %v15_v2 = vld [vmem:[%s1360_s0] sm:$0xff] }
   0x2   :  { %v1128_v3 = vpack.i.bf16 %v17_v1, %v16_v0  ;;  %v20_v4 = vld [vmem:[%s1360_s0 + $0x28] sm:$0xff]  ;;  %v21_v5 = vld [vmem:[%s1360_s0 + $0x30] sm:$0xff]  ;;  %v22_v6 = vld [vmem:[%s1360_s0 + $0x38] sm:$0xff] }
   0x3   :  { %v1139_v7 = vpack.i.bf16 %v20_v4, %v15_v2  ;;  %v18_v8 = vld [vmem:[%s1360_s0 + $0x18] sm:$0xff]  ;;  %v19_v9 = vld [vmem:[%s1360_s0 + $0x20] sm:$0xff]  ;;  %v1148_v10 = vpack.i.bf16 %v22_v6, %v21_v5 }
   0x4   :  { %889 = vrot.lane.b32.xlu0 %v1128_v3, %s1089_s28 }
   0x5   :  { %8 = vsyncpa [#allocation4], 0  ;;  %899 = vrot.lane.b32.xlu1 %v1139_v7, %s1089_s28  ;;  %v1151_v11 = vpack.i.bf16 %v19_v9, %v18_v8  ;;  %v23_v12 = vld [vmem:[%s1360_s0 + $0x40] sm:$0xff]  ;;  %v24_v13 = vld [vmem:[%s1360_s0 + $0x48] sm:$0xff]  ;;  %v802_v15 = vpack.c.bf16 %v21_v5, %v16_v0  ;;  %v804_v16 = vpack.c.bf16 %v20_v4, %v15_v2  ;;  %v840_v18 = vpack.c.bf16 %v22_v6, %v17_v1  ;;  %s1090_s6 = smov 126   ;;  %s1091_s0 = smov 96  }
   0x6   :  { %v908_v14 = vpack.i.bf16 %v24_v13, %v23_v12  ;;  %v838_v17 = vpack.c.bf16 %v23_v12, %v18_v8  ;;  %s1092_s7 = smov 95   ;;  %s1093_s8 = smov 94   ;;  %v404_v19 = vld [vmem:[%s1361_s1 + $0x8] sm:$0xff]  ;;  %vm479_vm0 = vcmask 130048   ;;  %v648_v20 = vld [vmem:[%s1362_s2] sm:$0xff]  ;;  %v1097_v21 = vmov 0  }
   0x7   :  { %803 = vmatprep.subr.bf16.mxu0 %v802_v15  ;;  %s1094_s9 = smov 64   ;;  %s1095_s10 = smov 63   ;;  %797 = vmatprep.mubr.msk.f32.mxu0 %vm479_vm0, %v404_v19  ;;  %vm63_vm1 = vcmask 1039360   ;;  %vm108_vm2 = vcmask 1031168   ;;  %vm153_vm3 = vcmask 785408   ;;  %vm198_vm4 = vcmask 777216  }
   0x8   :  { %894 = vrot.lane.b32.xlu0 %v1148_v10, %s1089_s28  ;;  %805 = vmatpush1.bf16.msra.mxu0 %v804_v16  ;;  %s1096_s13 = smov 62   ;;  %vm243_vm5 = vcmask 769024   ;;  %vm288_vm6 = vcmask 523264   ;;  %vm333_vm7 = vcmask 515072   ;;  %vm378_vm8 = vcmask 506880   ;;  %s1098_s22 = smov [#allocation3]  }
   0x9   :  { %904 = vrot.lane.b32.xlu1 %v1151_v11, %s1089_s28  ;;  %839 = vmatprep.subr.bf16.mxu1 %v838_v17  ;;  %s789_s23 = sshll.u32 %s1098_s22, 4  ;;  %s790_s23 = int_to_ptr.vmem [resolvable:$true] %s789_s23 }
   0xa   :  { %841 = vmatpush1.bf16.msra.mxu1 %v840_v18  ;;  %799 = vmatprep.mubr.msk.f32.mxu1 %vm479_vm0, %v404_v19  ;;  %s1065_s24 = scalar_lea.vmem %s790_s23, 16  ;;  %s1069_s25 = scalar_lea.vmem %s790_s23, 32 }
   0xb   :  { %1063 = vset.pattern.permute.xlu1 %v1097_v21  ;;  %1064 = vset.pattern.permute.xlu0 %v1097_v21  ;;  %p1066_p0 = scmp.ne.s32.totalorder %s790_s23, %s1065_s24  ;;  %p1070_p1 = scmp.lt.s32.totalorder %s790_s23, %s790_s23 }
   0xc   :  { %909 = vrot.lane.b32.xlu0 %v908_v14, %s1089_s28  ;;  %p1071_p2 = scmp.lt.s32.totalorder %s1069_s25, %s1065_s24 }
   0xd   :  { %914 = vrot.lane.b32.xlu1 %v1128_v3, %s1090_s6 }
   0xe   :  { %p1072_p3 = por %p1071_p2, %p1070_p1 }
  0x10   :  { %919 = vrot.lane.b32.xlu0 %v1148_v10, %s1090_s6  ;;  %p1073_p4 = pnand %p1072_p3, %p1066_p0 }
  0x11   :  { %924 = vrot.lane.b32.xlu1 %v1139_v7, %s1090_s6 }
  0x14   :  { %929 = vrot.lane.b32.xlu0 %v1151_v11, %s1090_s6 }
  0x15   :  { %934 = vrot.lane.b32.xlu1 %v908_v14, %s1090_s6 }
  0x18   :  { %939 = vrot.lane.b32.xlu0 %v1128_v3, %s1091_s0 }
  0x19   :  { %944 = vrot.lane.b32.xlu1 %v1148_v10, %s1091_s0 }
  0x1c   :  { %949 = vrot.lane.b32.xlu0 %v1139_v7, %s1091_s0 }
  0x1d   :  { %954 = vrot.lane.b32.xlu1 %v1151_v11, %s1091_s0 }
  0x20   :  { %959 = vrot.lane.b32.xlu0 %v908_v14, %s1091_s0 }
  0x21   :  { %180 = vrot.lane.b32.xlu1 %v16_v0, %s1092_s7 }
  0x24   :  { %182 = vrot.lane.b32.xlu0 %v17_v1, %s1092_s7 }
  0x25   :  { %190 = vrot.lane.b32.xlu1 %v21_v5, %s1092_s7 }
  0x28   :  { %192 = vrot.lane.b32.xlu0 %v22_v6, %s1092_s7 }
  0x29   :  { %178 = vrot.lane.b32.xlu1 %v15_v2, %s1092_s7 }
  0x2c   :  { %188 = vrot.lane.b32.xlu0 %v20_v4, %s1092_s7 }
  0x2d   :  { %184 = vrot.lane.b32.xlu1 %v18_v8, %s1092_s7 }
  0x30   :  { %186 = vrot.lane.b32.xlu0 %v19_v9, %s1092_s7 }
  0x31   :  { %194 = vrot.lane.b32.xlu1 %v23_v12, %s1092_s7 }
  0x34   :  { %196 = vrot.lane.b32.xlu0 %v24_v13, %s1092_s7 }
  0x35   :  { %964 = vrot.lane.b32.xlu1 %v1128_v3, %s1093_s8 }
  0x38   :  { %969 = vrot.lane.b32.xlu0 %v1148_v10, %s1093_s8 }
  0x39   :  { %974 = vrot.lane.b32.xlu1 %v1139_v7, %s1093_s8 }
  0x3c   :  { %979 = vrot.lane.b32.xlu0 %v1151_v11, %s1093_s8 }
  0x3d   :  { %984 = vrot.lane.b32.xlu1 %v908_v14, %s1093_s8 }
  0x40   :  { %989 = vrot.lane.b32.xlu0 %v1128_v3, %s1094_s9 }
  0x41   :  { %994 = vrot.lane.b32.xlu1 %v1148_v10, %s1094_s9 }
  0x44   :  { %999 = vrot.lane.b32.xlu0 %v1139_v7, %s1094_s9 }
  0x45   :  { %1004 = vrot.lane.b32.xlu1 %v1151_v11, %s1094_s9 }
  0x48   :  { %1009 = vrot.lane.b32.xlu0 %v908_v14, %s1094_s9 }
  0x49   :  { %1014 = vrot.lane.b32.xlu1 %v1128_v3, %s1095_s10 }
  0x4c   :  { %1019 = vrot.lane.b32.xlu0 %v1148_v10, %s1095_s10 }
  0x4d   :  { %1024 = vrot.lane.b32.xlu1 %v1139_v7, %s1095_s10 }
  0x50   :  { %1029 = vrot.lane.b32.xlu0 %v1151_v11, %s1095_s10 }
  0x51   :  { %1034 = vrot.lane.b32.xlu1 %v908_v14, %s1095_s10 }
  0x54   :  { %1039 = vrot.lane.b32.xlu0 %v1128_v3, %s1096_s13 }
  0x55   :  { %1044 = vrot.lane.b32.xlu1 %v1148_v10, %s1096_s13 }
  0x58   :  { %1049 = vrot.lane.b32.xlu0 %v1139_v7, %s1096_s13 }
  0x59   :  { %1054 = vrot.lane.b32.xlu1 %v1151_v11, %s1096_s13 }
  0x5c   :  { %1059 = vrot.lane.b32.xlu0 %v908_v14, %s1096_s13 }
  0x5d   :  { %651 = vperm.xlu1 %1063, %v648_v20  }
  0x76   :  { %v890_v22 = vpop.permute.xlu0 %889 }
  0x77   :  { %v900_v23 = vpop.permute.xlu1 %899  ;;  %v892_v24 = vunpack.i.h.bf16 %v890_v22  ;;  %v891_v25 = vunpack.i.l.bf16 %v890_v22 }
  0x78   :  { %v902_v26 = vunpack.i.h.bf16 %v900_v23  ;;  %v901_v27 = vunpack.i.l.bf16 %v900_v23 }
  0x79   :  { %v65_v33 = vsel %vm63_vm1, %v891_v25, %v892_v24 }
  0x7a   :  { %v895_v28 = vpop.permute.xlu0 %894  ;;  %v64_v36 = vsel %vm63_vm1, %v901_v27, %v891_v25 }
  0x7b   :  { %v897_v29 = vunpack.i.h.bf16 %v895_v28  ;;  %v896_v30 = vunpack.i.l.bf16 %v895_v28  ;;  %v905_v31 = vpop.permute.xlu1 %904 }
  0x7c   :  { %v907_v32 = vunpack.i.h.bf16 %v905_v31  ;;  %v906_v34 = vunpack.i.l.bf16 %v905_v31 }
  0x7d   :  { %v69_v35 = vsel %vm63_vm1, %v896_v30, %v897_v29  ;;  %v68_v37 = vsel %vm63_vm1, %v902_v26, %v896_v30 }
  0x7e   :  { %v910_v38 = vpop.permute.xlu0 %909  ;;  %v806_v39 = vpack.c.bf16 %v69_v35, %v65_v33  ;;  %v808_v40 = vpack.c.bf16 %v68_v37, %v64_v36  ;;  %v67_v44 = vsel %vm63_vm1, %v906_v34, %v907_v32  ;;  %v66_v48 = vsel %vm63_vm1, %v892_v24, %v906_v34 }
  0x7f   :  { %v912_v41 = vunpack.i.h.bf16 %v910_v38  ;;  %v911_v42 = vunpack.i.l.bf16 %v910_v38  ;;  %v915_v43 = vpop.permute.xlu1 %914 }
  0x80   :  { %v917_v45 = vunpack.i.h.bf16 %v915_v43  ;;  %v916_v46 = vunpack.i.l.bf16 %v915_v43  ;;  %807 = vmatprep.subr.bf16.mxu0 %v806_v39 }
  0x81   :  { %809 = vmatpush1.bf16.msra.mxu0 %v808_v40  ;;  %v71_v47 = vsel %vm63_vm1, %v911_v42, %v912_v41  ;;  %v70_v49 = vsel %vm63_vm1, %v897_v29, %v911_v42 }
  0x82   :  { %v920_v50 = vpop.permute.xlu0 %919  ;;  %v842_v51 = vpack.c.bf16 %v71_v47, %v67_v44  ;;  %v844_v52 = vpack.c.bf16 %v70_v49, %v66_v48  ;;  %v110_v56 = vsel %vm108_vm2, %v916_v46, %v917_v45 }
  0x83   :  { %v922_v53 = vunpack.i.h.bf16 %v920_v50  ;;  %v921_v54 = vunpack.i.l.bf16 %v920_v50  ;;  %v925_v55 = vpop.permute.xlu1 %924 }
  0x84   :  { %v927_v57 = vunpack.i.h.bf16 %v925_v55  ;;  %v926_v58 = vunpack.i.l.bf16 %v925_v55  ;;  %843 = vmatprep.subr.bf16.mxu1 %v842_v51 }
  0x85   :  { %845 = vmatpush1.bf16.msra.mxu1 %v844_v52  ;;  %v114_v59 = vsel %vm108_vm2, %v921_v54, %v922_v53 }
  0x86   :  { %v930_v60 = vpop.permute.xlu0 %929  ;;  %v810_v61 = vpack.c.bf16 %v114_v59, %v110_v56  ;;  %v109_v62 = vsel %vm108_vm2, %v926_v58, %v916_v46  ;;  %v113_v63 = vsel %vm108_vm2, %v927_v57, %v921_v54 }
  0x87   :  { %v932_v0 = vunpack.i.h.bf16 %v930_v60  ;;  %v931_v1 = vunpack.i.l.bf16 %v930_v60  ;;  %v935_v2 = vpop.permute.xlu1 %934  ;;  %v812_v3 = vpack.c.bf16 %v113_v63, %v109_v62 }
  0x88   :  { %v937_v4 = vunpack.i.h.bf16 %v935_v2  ;;  %v936_v5 = vunpack.i.l.bf16 %v935_v2  ;;  %811 = vmatprep.subr.bf16.mxu0 %v810_v61 }
  0x89   :  { %813 = vmatpush1.bf16.msra.mxu0 %v812_v3  ;;  %v112_v6 = vsel %vm108_vm2, %v931_v1, %v932_v0  ;;  %v111_v7 = vsel %vm108_vm2, %v917_v45, %v931_v1 }
  0x8a   :  { %v940_v8 = vpop.permute.xlu0 %939  ;;  %v116_v9 = vsel %vm108_vm2, %v936_v5, %v937_v4  ;;  %v115_v10 = vsel %vm108_vm2, %v922_v53, %v936_v5 }
  0x8b   :  { %v942_v11 = vunpack.i.h.bf16 %v940_v8  ;;  %v941_v12 = vunpack.i.l.bf16 %v940_v8  ;;  %v945_v13 = vpop.permute.xlu1 %944  ;;  %v846_v14 = vpack.c.bf16 %v116_v9, %v112_v6  ;;  %v848_v15 = vpack.c.bf16 %v115_v10, %v111_v7 }
  0x8c   :  { %v947_v16 = vunpack.i.h.bf16 %v945_v13  ;;  %v946_v17 = vunpack.i.l.bf16 %v945_v13 }
  0x8d   :  { %847 = vmatprep.subr.bf16.mxu1 %v846_v14  ;;  %v155_v18 = vsel %vm153_vm3, %v941_v12, %v942_v11 }
  0x8e   :  { %849 = vmatpush1.bf16.msra.mxu1 %v848_v15  ;;  %v950_v19 = vpop.permute.xlu0 %949  ;;  %v159_v20 = vsel %vm153_vm3, %v946_v17, %v947_v16 }
  0x8f   :  { %v952_v21 = vunpack.i.h.bf16 %v950_v19  ;;  %v951_v22 = vunpack.i.l.bf16 %v950_v19  ;;  %v955_v23 = vpop.permute.xlu1 %954  ;;  %v814_v24 = vpack.c.bf16 %v159_v20, %v155_v18 }
  0x90   :  { %v957_v25 = vunpack.i.h.bf16 %v955_v23  ;;  %v956_v26 = vunpack.i.l.bf16 %v955_v23 }
  0x91   :  { %815 = vmatprep.subr.bf16.mxu0 %v814_v24  ;;  %v154_v27 = vsel %vm153_vm3, %v951_v22, %v941_v12  ;;  %v158_v28 = vsel %vm153_vm3, %v952_v21, %v946_v17 }
  0x92   :  { %v960_v29 = vpop.permute.xlu0 %959  ;;  %v816_v30 = vpack.c.bf16 %v158_v28, %v154_v27  ;;  %v157_v34 = vsel %vm153_vm3, %v956_v26, %v957_v25  ;;  %v156_v36 = vsel %vm153_vm3, %v942_v11, %v956_v26 }
  0x93   :  { %v962_v31 = vunpack.i.h.bf16 %v960_v29  ;;  %v961_v32 = vunpack.i.l.bf16 %v960_v29  ;;  %v181_v33 = vpop.permute.xlu1 %180 }
  0x94   :  { %817 = vmatpush1.bf16.msra.mxu0 %v816_v30 }
  0x95   :  { %v161_v35 = vsel %vm153_vm3, %v961_v32, %v962_v31  ;;  %v160_v37 = vsel %vm153_vm3, %v947_v16, %v961_v32 }
  0x96   :  { %v183_v38 = vpop.permute.xlu0 %182  ;;  %v850_v39 = vpack.c.bf16 %v161_v35, %v157_v34  ;;  %v852_v40 = vpack.c.bf16 %v160_v37, %v156_v36 }
  0x97   :  { %v191_v41 = vpop.permute.xlu1 %190  ;;  %v1218_v43 = vsel %vm198_vm4, %v181_v33, %v183_v38 }
  0x98   :  { %851 = vmatprep.subr.bf16.mxu1 %v850_v39 }
  0x99   :  { %853 = vmatpush1.bf16.msra.mxu1 %v852_v40 }
  0x9a   :  { %v193_v42 = vpop.permute.xlu0 %192 }
  0x9b   :  { %v1221_v44 = vsel %vm198_vm4, %v191_v41, %v193_v42  ;;  %v179_v45 = vpop.permute.xlu1 %178 }
  0x9c   :  { %v818_v46 = vpack.c.bf16 %v1221_v44, %v1218_v43  ;;  %v1226_v48 = vsel %vm198_vm4, %v179_v45, %v181_v33 }
  0x9e   :  { %v189_v47 = vpop.permute.xlu0 %188  ;;  %819 = vmatprep.subr.bf16.mxu0 %v818_v46 }
  0x9f   :  { %v1229_v49 = vsel %vm198_vm4, %v189_v47, %v191_v41  ;;  %v185_v50 = vpop.permute.xlu1 %184 }
  0xa0   :  { %v820_v51 = vpack.c.bf16 %v1229_v49, %v1226_v48  ;;  %v1243_v59 = vsel %vm198_vm4, %v183_v38, %v185_v50 }
  0xa2   :  { %v187_v52 = vpop.permute.xlu0 %186  ;;  %821 = vmatpush1.bf16.msra.mxu0 %v820_v51 }
  0xa3   :  { %v195_v53 = vpop.permute.xlu1 %194  ;;  %v1237_v56 = vsel %vm198_vm4, %v185_v50, %v187_v52 }
  0xa4   :  { %v1234_v54 = vsel %vm198_vm4, %v193_v42, %v195_v53 }
  0xa5   :  { %v856_v63 = vpack.c.bf16 %v1234_v54, %v1243_v59 }
  0xa6   :  { %v197_v55 = vpop.permute.xlu0 %196 }
  0xa7   :  { %v1240_v57 = vsel %vm198_vm4, %v195_v53, %v197_v55  ;;  %v965_v58 = vpop.permute.xlu1 %964 }
  0xa8   :  { %v854_v60 = vpack.c.bf16 %v1240_v57, %v1237_v56  ;;  %v967_v61 = vunpack.i.h.bf16 %v965_v58  ;;  %v966_v62 = vunpack.i.l.bf16 %v965_v58 }
  0xaa   :  { %v970_v0 = vpop.permute.xlu0 %969  ;;  %855 = vmatprep.subr.bf16.mxu1 %v854_v60  ;;  %v245_v4 = vsel %vm243_vm5, %v966_v62, %v967_v61 }
  0xab   :  { %v972_v1 = vunpack.i.h.bf16 %v970_v0  ;;  %v971_v2 = vunpack.i.l.bf16 %v970_v0  ;;  %v975_v3 = vpop.permute.xlu1 %974  ;;  %857 = vmatpush1.bf16.msra.mxu1 %v856_v63 }
  0xac   :  { %v977_v5 = vunpack.i.h.bf16 %v975_v3  ;;  %v976_v6 = vunpack.i.l.bf16 %v975_v3 }
  0xad   :  { %v249_v7 = vsel %vm243_vm5, %v971_v2, %v972_v1 }
  0xae   :  { %v980_v8 = vpop.permute.xlu0 %979  ;;  %v822_v9 = vpack.c.bf16 %v249_v7, %v245_v4  ;;  %v244_v10 = vsel %vm243_vm5, %v976_v6, %v966_v62  ;;  %v248_v11 = vsel %vm243_vm5, %v977_v5, %v971_v2 }
  0xaf   :  { %v982_v12 = vunpack.i.h.bf16 %v980_v8  ;;  %v981_v13 = vunpack.i.l.bf16 %v980_v8  ;;  %v985_v14 = vpop.permute.xlu1 %984  ;;  %v824_v15 = vpack.c.bf16 %v248_v11, %v244_v10 }
  0xb0   :  { %v987_v16 = vunpack.i.h.bf16 %v985_v14  ;;  %v986_v17 = vunpack.i.l.bf16 %v985_v14  ;;  %823 = vmatprep.subr.bf16.mxu0 %v822_v9 }
  0xb1   :  { %825 = vmatpush1.bf16.msra.mxu0 %v824_v15  ;;  %v247_v18 = vsel %vm243_vm5, %v981_v13, %v982_v12  ;;  %v246_v19 = vsel %vm243_vm5, %v967_v61, %v981_v13 }
  0xb2   :  { %v990_v20 = vpop.permute.xlu0 %989  ;;  %v251_v21 = vsel %vm243_vm5, %v986_v17, %v987_v16  ;;  %v250_v22 = vsel %vm243_vm5, %v972_v1, %v986_v17  ;;  %vm781_vm5 = vcmask 0  }
  0xb3   :  { %v992_v23 = vunpack.i.h.bf16 %v990_v20  ;;  %v991_v24 = vunpack.i.l.bf16 %v990_v20  ;;  %v995_v25 = vpop.permute.xlu1 %994  ;;  %v858_v26 = vpack.c.bf16 %v251_v21, %v247_v18  ;;  %v860_v27 = vpack.c.bf16 %v250_v22, %v246_v19 }
  0xb4   :  { %v997_v28 = vunpack.i.h.bf16 %v995_v25  ;;  %v996_v29 = vunpack.i.l.bf16 %v995_v25 }
  0xb5   :  { %859 = vmatprep.subr.bf16.mxu1 %v858_v26  ;;  %v290_v30 = vsel %vm288_vm6, %v991_v24, %v992_v23 }
  0xb6   :  { %861 = vmatpush1.bf16.msra.mxu1 %v860_v27  ;;  %v1000_v31 = vpop.permute.xlu0 %999  ;;  %v294_v32 = vsel %vm288_vm6, %v996_v29, %v997_v28 }
  0xb7   :  { %v1002_v33 = vunpack.i.h.bf16 %v1000_v31  ;;  %v1001_v34 = vunpack.i.l.bf16 %v1000_v31  ;;  %v1005_v35 = vpop.permute.xlu1 %1004  ;;  %v826_v36 = vpack.c.bf16 %v294_v32, %v290_v30 }
  0xb8   :  { %v1007_v37 = vunpack.i.h.bf16 %v1005_v35  ;;  %v1006_v38 = vunpack.i.l.bf16 %v1005_v35 }
  0xb9   :  { %827 = vmatprep.subr.bf16.mxu0 %v826_v36  ;;  %v289_v39 = vsel %vm288_vm6, %v1001_v34, %v991_v24  ;;  %v293_v40 = vsel %vm288_vm6, %v1002_v33, %v996_v29 }
  0xba   :  { %v1010_v41 = vpop.permute.xlu0 %1009  ;;  %v828_v42 = vpack.c.bf16 %v293_v40, %v289_v39  ;;  %v292_v50 = vsel %vm288_vm6, %v1006_v38, %v1007_v37  ;;  %v291_v55 = vsel %vm288_vm6, %v992_v23, %v1006_v38 }
  0xbb   :  { %v1012_v45 = vunpack.i.h.bf16 %v1010_v41  ;;  %v1011_v46 = vunpack.i.l.bf16 %v1010_v41  ;;  %v1015_v47 = vpop.permute.xlu1 %1014 }
  0xbc   :  { %v1017_v51 = vunpack.i.h.bf16 %v1015_v47  ;;  %v1016_v52 = vunpack.i.l.bf16 %v1015_v47  ;;  %829 = vmatpush1.bf16.msra.mxu0 %v828_v42 }
  0xbd   :  { %v296_v53 = vsel %vm288_vm6, %v1011_v46, %v1012_v45  ;;  %v295_v58 = vsel %vm288_vm6, %v997_v28, %v1011_v46  ;;  %v403_v46 = vld [vmem:[%s1361_s1] sm:$0xff] }
  0xbe   :  { %v1020_v60 = vpop.permute.xlu0 %1019  ;;  %v862_v61 = vpack.c.bf16 %v296_v53, %v292_v50  ;;  %v864_v62 = vpack.c.bf16 %v295_v58, %v291_v55  ;;  %v335_v2 = vsel %vm333_vm7, %v1016_v52, %v1017_v51  ;;  %v405_v58 = vld [vmem:[%s1361_s1 + $0x10] sm:$0xff] }
  0xbf   :  { %v1022_v63 = vunpack.i.h.bf16 %v1020_v60  ;;  %v1021_v0 = vunpack.i.l.bf16 %v1020_v60  ;;  %v1025_v1 = vpop.permute.xlu1 %1024  ;;  %v658_v60 = vlaneseq }
  0xc0   :  { %v1027_v3 = vunpack.i.h.bf16 %v1025_v1  ;;  %v1026_v4 = vunpack.i.l.bf16 %v1025_v1  ;;  %863 = vmatprep.subr.bf16.mxu1 %v862_v61 }
  0xc1   :  { %865 = vmatpush1.bf16.msra.mxu1 %v864_v62  ;;  %v339_v5 = vsel %vm333_vm7, %v1021_v0, %v1022_v63  ;;  %v659_v61 = vand.u32 127, %v658_v60 }
  0xc2   :  { %v1030_v6 = vpop.permute.xlu0 %1029  ;;  %v830_v7 = vpack.c.bf16 %v339_v5, %v335_v2  ;;  %v334_v8 = vsel %vm333_vm7, %v1026_v4, %v1016_v52  ;;  %v338_v9 = vsel %vm333_vm7, %v1027_v3, %v1021_v0  ;;  %v406_v52 = vld [vmem:[%s1361_s1 + $0x18] sm:$0xff] }
  0xc3   :  { %v1032_v10 = vunpack.i.h.bf16 %v1030_v6  ;;  %v1031_v11 = vunpack.i.l.bf16 %v1030_v6  ;;  %v1035_v12 = vpop.permute.xlu1 %1034  ;;  %v832_v13 = vpack.c.bf16 %v338_v9, %v334_v8  ;;  %v660_v62 = vadd.s32 128, %v659_v61 }
  0xc4   :  { %v1037_v14 = vunpack.i.h.bf16 %v1035_v12  ;;  %v1036_v15 = vunpack.i.l.bf16 %v1035_v12  ;;  %831 = vmatprep.subr.bf16.mxu0 %v830_v7  ;;  %v661_v0 = vadd.s32 256, %v659_v61  ;;  %v662_v3 = vadd.s32 384, %v659_v61 }
  0xc5   :  { %833 = vmatpush1.bf16.msra.mxu0 %v832_v13  ;;  %v337_v16 = vsel %vm333_vm7, %v1031_v11, %v1032_v10  ;;  %v336_v17 = vsel %vm333_vm7, %v1017_v51, %v1031_v11  ;;  %v674_v2 = vand.u32 31, %v660_v62 }
  0xc6   :  { %v1040_v18 = vpop.permute.xlu0 %1039  ;;  %v341_v19 = vsel %vm333_vm7, %v1036_v15, %v1037_v14  ;;  %v340_v20 = vsel %vm333_vm7, %v1022_v63, %v1036_v15  ;;  %v667_v63 = vand.u32 31, %v659_v61  ;;  %v681_v9 = vand.u32 31, %v661_v0 }
  0xc7   :  { %v1042_v21 = vunpack.i.h.bf16 %v1040_v18  ;;  %v1041_v22 = vunpack.i.l.bf16 %v1040_v18  ;;  %v1045_v23 = vpop.permute.xlu1 %1044  ;;  %v866_v24 = vpack.c.bf16 %v341_v19, %v337_v16  ;;  %v868_v25 = vpack.c.bf16 %v340_v20, %v336_v17 }
  0xc8   :  { %v1047_v26 = vunpack.i.h.bf16 %v1045_v23  ;;  %v1046_v27 = vunpack.i.l.bf16 %v1045_v23  ;;  %vm1292_vm9 = vcmp.ge.s32.totalorder %v667_v63, 1  ;;  %vm1296_vm10 = vcmp.le.s32.totalorder %v667_v63, 16 }
  0xc9   :  { %867 = vmatprep.subr.bf16.mxu1 %v866_v24  ;;  %v380_v28 = vsel %vm378_vm8, %v1041_v22, %v1042_v21  ;;  %vm1300_vm11 = vcmp.ge.s32.totalorder %v674_v2, 1  ;;  %vm1304_vm12 = vcmp.le.s32.totalorder %v674_v2, 16  ;;  %v688_v14 = vand.u32 31, %v662_v3  ;;  %vm719_vm13 = vmand %vm1292_vm9, %vm1296_vm10 }
  0xca   :  { %869 = vmatpush1.bf16.msra.mxu1 %v868_v25  ;;  %v1050_v29 = vpop.permute.xlu0 %1049  ;;  %v384_v30 = vsel %vm378_vm8, %v1046_v27, %v1047_v26  ;;  %vm720_vm14 = vmand %vm1300_vm11, %vm1304_vm12  ;;  %vm1319_vm15 = vcmp.ge.s32.totalorder %v681_v9, 1 }
  0xcb   :  { %v1052_v31 = vunpack.i.h.bf16 %v1050_v29  ;;  %v1051_v32 = vunpack.i.l.bf16 %v1050_v29  ;;  %v1055_v33 = vpop.permute.xlu1 %1054  ;;  %v834_v34 = vpack.c.bf16 %v384_v30, %v380_v28  ;;  %vm1328_vm1 = vcmp.ge.s32.totalorder %v688_v14, 1 }
  0xcc   :  { %v1057_v35 = vunpack.i.h.bf16 %v1055_v33  ;;  %v1056_v36 = vunpack.i.l.bf16 %v1055_v33  ;;  %vm1332_vm2 = vcmp.le.s32.totalorder %v688_v14, 16 }
  0xcd   :  { %835 = vmatprep.subr.bf16.mxu0 %v834_v34  ;;  %v379_v37 = vsel %vm378_vm8, %v1051_v32, %v1041_v22  ;;  %v383_v38 = vsel %vm378_vm8, %v1052_v31, %v1046_v27  ;;  %vm722_vm4 = vmand %vm1328_vm1, %vm1332_vm2 }
  0xce   :  { %v1060_v39 = vpop.permute.xlu0 %1059  ;;  %v836_v40 = vpack.c.bf16 %v383_v38, %v379_v37  ;;  %v382_v45 = vsel %vm378_vm8, %v1056_v36, %v1057_v35  ;;  %v381_v50 = vsel %vm378_vm8, %v1042_v21, %v1056_v36 }
  0xcf   :  { %v1062_v41 = vunpack.i.h.bf16 %v1060_v39  ;;  %v1061_v42 = vunpack.i.l.bf16 %v1060_v39 }
  0xd0   :  { %837 = vmatpush1.bf16.msra.mxu0 %v836_v40 }
  0xd1   :  { %v386_v47 = vsel %vm378_vm8, %v1061_v42, %v1062_v41  ;;  %v385_v51 = vsel %vm378_vm8, %v1047_v26, %v1061_v42 }
  0xd2   :  { %v870_v53 = vpack.c.bf16 %v386_v47, %v382_v45  ;;  %v872_v55 = vpack.c.bf16 %v385_v51, %v381_v50 }
  0xd3   :  { %551 = vmatmul.mubr.f32.vlgmr.msra.gmra.mrb[0].mxu0 %v403_v46 }
  0xd4   :  { %871 = vmatprep.subr.bf16.mxu1 %v870_v53  ;;  %798 = vmatprep.mubr.msk.f32.mxu0 %vm479_vm0, %v406_v52 }
  0xd5   :  { %873 = vmatpush1.bf16.msra.mxu1 %v872_v55 }
  0xd7   :  { %557 = vmatmul.mubr.f32.gmra.mrb[2].mxu0 %v405_v58 }
  0xd8   :  { %628 = vmatmul.mubr.f32.vlgmr.msra.gmra.mrb[0].mxu1 %v403_v46 }
  0xd9   :  { %800 = vmatprep.mubr.msk.f32.mxu1 %vm479_vm0, %v406_v52  ;;  %vm1324_vm0 = vcmp.le.s32.totalorder %v681_v9, 16 }
  0xda   :  { %vm721_vm3 = vmand %vm1319_vm15, %vm1324_vm0 }
  0xdc   :  { %634 = vmatmul.mubr.f32.gmra.mrb[2].mxu1 %v405_v58  ;;  %v652_v1 = vpop.permute.xlu1 %651 }
 0x1a6   :  { %v552_v4 = vpop.f32.mrb[0].mxu0 }
 0x1a7   :  { %v654_v5 = vadd.f32 %v652_v1, %v552_v4  ;;  %v554_v8 = vpop.f32.mrb[1].mxu0 }
 0x1a8   :  { %v655_v10 = vadd.f32 %v652_v1, %v554_v8 }
 0x1a9   :  { %v723_v13 = vsub.f32 %v1226_v48, %v654_v5 }
 0x1aa   :  { %v724_v15 = vsub.f32 %v1218_v43, %v655_v10  ;;  %v558_v16 = vpop.f32.mrb[2].mxu0 }
 0x1ab   :  { %v727_v17 = vmul.f32 %v723_v13, %v723_v13  ;;  %v758_v18 = vmul.f32 %v558_v16, %v1229_v49  ;;  %v560_v19 = vpop.f32.mrb[3].mxu0  ;;  %v629_v20 = vpop.f32.mrb[0].mxu1 }
 0x1ac   :  { %v728_v21 = vmul.f32 %v724_v15, %v724_v15  ;;  %v759_v22 = vmul.f32 %v560_v19, %v1221_v44  ;;  %v656_v23 = vadd.f32 %v652_v1, %v629_v20  ;;  %v631_v43 = vpop.f32.mrb[1].mxu1 }
 0x1ad   :  { %v739_v25 = vsel %vm719_vm13, %v727_v17, 0.0  ;;  %v657_v26 = vadd.f32 %v652_v1, %v631_v43 }
 0x1ae   :  { %v740_v28 = vsel %vm720_vm14, %v728_v21, 0.0  ;;  %v762_v29 = vadd.f32 %v759_v22, %v758_v18  ;;  %v725_v44 = vsub.f32 %v1243_v59, %v656_v23 }
 0x1af   :  { %v726_v30 = vsub.f32 %v1237_v56, %v657_v26  ;;  %v635_v31 = vpop.f32.mrb[2].mxu1  ;;  %v743_v32 = vadd.f32 %v740_v28, %v739_v25 }
 0x1b0   :  { %v729_v33 = vmul.f32 %v725_v44, %v725_v44  ;;  %v760_v34 = vmul.f32 %v635_v31, %v1234_v54  ;;  %v637_v35 = vpop.f32.mrb[3].mxu1 }
 0x1b1   :  { %v730_v36 = vmul.f32 %v726_v30, %v726_v30  ;;  %v761_v59 = vmul.f32 %v637_v35, %v1240_v57 }
 0x1b2   :  { %v763_v56 = vadd.f32 %v762_v29, %v760_v34  ;;  %v741_v37 = vsel %vm721_vm3, %v729_v33, 0.0 }
 0x1b3   :  { %v742_v38 = vsel %vm722_vm4, %v730_v36, 0.0  ;;  %v744_v39 = vadd.f32 %v743_v32, %v741_v37 }
 0x1b4   :  { %v764_v40 = vadd.f32 %v763_v56, %v761_v59 }
 0x1b5   :  { %v745_v41 = vadd.f32 %v744_v39, %v742_v38 }
 0x1b6   :  { %765 = vadd.xlane.f32.xlu1 %v764_v40 }
 0x1b7   :  { %746 = vadd.xlane.f32.xlu0 %v745_v41 }
 0x243   :  { %v766_v42 = vpop.xlane.xlu1 %765 }
 0x244   :  { %v767_v45 = vrot.slane %v766_v42, 4  ;;  %v747_v54 = vpop.xlane.xlu0 %746 }
 0x245   :  { %v748_v46 = vrot.slane %v747_v54, 4 }
 0x246   :  { %v768_v47 = vadd.f32 %v767_v45, %v766_v42 }
 0x247   :  { %v749_v50 = vadd.f32 %v748_v46, %v747_v54 }
 0x248   :  { %v769_v51 = vrot.slane %v768_v47, 2 }
 0x249   :  { %v750_v52 = vrot.slane %v749_v50, 2 }
 0x24a   :  { %v770_v53 = vadd.f32 %v769_v51, %v768_v47 }
 0x24b   :  { %v751_v55 = vadd.f32 %v750_v52, %v749_v50 }
 0x24c   :  { %v771_v58 = vrot.slane %v770_v53, 1 }
 0x24d   :  { %v752_v57 = vrot.slane %v751_v55, 1 }
 0x24e   :  { %v772_v60 = vadd.f32 %v771_v58, %v770_v53 }
 0x24f   :  { %v753_v61 = vadd.f32 %v752_v57, %v751_v55 }
 0x251   :  { %874 = vpush %v753_v61 }
 0x252   :  { %876 = vpush %v772_v60 }
 0x282   :  { %s875_s1 = spop %874 }
 0x283   :  { %v755_v62 = vstv %s875_s1  ;;  %s877_s21 = spop %876 }
 0x284   :  { %v757_v63 = vmul.f32 0.00048828125, %v755_v62  ;;  %v774_v0 = vstv %s877_s21 }
 0x285   :  { %v776_v1 = vmul.f32 0.0009765625, %v774_v0 }
 0x286   :  { %v801_v2 = vadd.f32 -0.01, %v757_v63 }
 0x287   :  { %v778_v3 = vmul.f32 0.02, %v776_v1 }
 0x289   :  { %v779_v4 = vadd.f32 %v801_v2, %v778_v3 }
 0x28b   :  { %v780_v5 = vand.u32 2147483647, %v779_v4 }
 0x28d   :  { %782 = vst.msk [vmem:[#allocation3] sm:$0x1] %vm781_vm5, %v780_v5 }
 0x28e   :  { %1076 = shalt.err (!%p1073_p4)
}
 0x28f   :  { %s1077_s28 = scalar_lea.hbm %s1363_s3, 16 }
 0x290   :  { %p1078_p5 = scmp.ne.s32.totalorder %s1363_s3, %s1077_s28  ;;  %p1081_p6 = scmp.lt.u32.totalorder %s1077_s28, %s1363_s3 }
 0x292   :  { %p1083_p7 = pnand %p1081_p6, %p1078_p5 }
 0x294   :  { %1086 = shalt.err (!%p1083_p7)
}
 0x295   :  { %792 = dma.vmem_to_hbm [thread:$0]  %s790_s23, 16, %s1363_s3, [#allocation4]  }
 0x296   :  { %1087 = dma.done.wait [#allocation4], 16  }
 0x297   :  { %1088 = vsyncadd [#allocation4], 4294967280 }
 0x298   :  { %796 = vsyncpa [#allocation4], 1 }

</bundles_post_ra>
